<compile_context>
chip_gen: v6e
topology: v6e:2x2x1
jax: 0.10.0
libtpu: 0.0.40
codegen_flags: <defaults>
</compile_context>

<pallas_src>
import numpy as np
import jax
import jax.numpy as jnp
from jax.experimental import pallas as pl
from jax.experimental.pallas import tpu as pltpu


def _transition_kernel(x_ref, scale_ref, bias_ref, w_ref, o_ref):
    # x_ref: (RB, Wo, 2*Cin) -- each pair of adjacent input columns is packed
    #        side-by-side on the lane axis by the wrapper.
    rb, wo, c2 = x_ref.shape
    cin = c2 // 2

    x = x_ref[...]
    # BatchNorm2d (inference affine) + ReLU   (VPU)
    a = jnp.maximum(x * scale_ref[...] + bias_ref[...], 0.0)

    # 2x2 average pool (VPU, no MXU / no dense pooling matrix):
    #   column pairs: lane-axis halves; row pairs: leading-dim reshape.
    col = a[:, :, :cin] + a[:, :, cin:]                  # (RB, Wo, Cin)
    rows = col.reshape(rb // 2, 2, wo, cin)              # split leading dim only
    pooled = (rows[:, 0] + rows[:, 1]) * 0.25            # (RB/2, Wo, Cin)

    # 1x1 conv (no bias) == channel matmul on the *pooled* activations (MXU).
    # Cast activations to the weight dtype (bf16 path when enabled), f32 acc.
    m = pooled.reshape((rb // 2) * wo, cin).astype(w_ref.dtype)
    y = jnp.dot(m, w_ref[...], preferred_element_type=jnp.float32)
    o_ref[...] = y.reshape(rb // 2, wo, -1).astype(o_ref.dtype)


def _pick_row_block(h_even, target=8):
    """Largest even divisor of h_even that is <= target (at least 2)."""
    best = 2
    for d in range(2, min(h_even, target) + 1, 2):
        if h_even % d == 0:
            best = d
    return best


def transition_forward(x_nchw, gamma, beta, running_mean, running_var, conv_w,
                       eps=1e-5, *, row_block=None, use_bf16_matmul=False):
    """Forward of _Transition. x_nchw: (N, Cin, H, W); conv_w: (Cout, Cin, 1, 1)."""
    # TODO(synk): BatchNorm2d is implemented in inference mode (running stats);
    #             PyTorch training-mode batch statistics are not reproduced.
    N, Cin, H, W = x_nchw.shape
    Cout = conv_w.shape[0]
    Ho, Wo = H // 2, W // 2
    He, We = 2 * Ho, 2 * Wo          # AvgPool2d(2,2) drops any odd trailing row/col

    # NCHW -> NHWC (channels on lanes), crop odd edges, and pack each pair of
    # adjacent columns onto the lane axis: (N, He, Wo, 2*Cin).  The reshape is
    # contiguous (free) and fuses with the transpose copy.
    x = jnp.transpose(x_nchw[:, :, :He, :We], (0, 2, 3, 1)).reshape(N, He, Wo, 2 * Cin)

    scale = gamma / jnp.sqrt(running_var + eps)          # (Cin,)
    bias = beta - running_mean * scale                   # (Cin,)
    scale2 = jnp.tile(scale, 2).reshape(1, 2 * Cin)      # matches packed lane layout
    bias2 = jnp.tile(bias, 2).reshape(1, 2 * Cin)

    w = jnp.transpose(conv_w.reshape(Cout, Cin), (1, 0))  # (Cin, Cout)
    if use_bf16_matmul:
        # bf16 MXU operands, f32 accumulation (v5e/v6e/v7x MXU are bf16-native).
        w = w.astype(jnp.bfloat16)

    rb = row_block if row_block is not None else _pick_row_block(He)
    assert He % rb == 0 and rb % 2 == 0, (He, rb)

    out_nhwc = pl.pallas_call(
        _transition_kernel,
        out_shape=jax.ShapeDtypeStruct((N, Ho, Wo, Cout), x_nchw.dtype),
        grid=(N, He // rb),
        in_specs=[
            pl.BlockSpec((None, rb, Wo, 2 * Cin), lambda n, r: (n, r, 0, 0)),
            pl.BlockSpec((1, 2 * Cin), lambda n, r: (0, 0)),
            pl.BlockSpec((1, 2 * Cin), lambda n, r: (0, 0)),
            pl.BlockSpec((Cin, Cout), lambda n, r: (0, 0)),
        ],
        out_specs=pl.BlockSpec((None, rb // 2, Wo, Cout), lambda n, r: (n, r, 0, 0)),
        compiler_params=pltpu.CompilerParams(
            dimension_semantics=("parallel", "parallel")),
    )(x, scale2, bias2, w)

    return jnp.transpose(out_nhwc, (0, 3, 1, 2))          # back to NCHW


def _reference(x_nchw, gamma, beta, mean, var, conv_w, eps=1e-5):
    scale = gamma / jnp.sqrt(var + eps)
    bias = beta - mean * scale
    a = jnp.maximum(x_nchw * scale[None, :, None, None] + bias[None, :, None, None], 0.0)
    w2d = conv_w.reshape(conv_w.shape[0], conv_w.shape[1])
    y = jnp.einsum('nchw,oc->nohw', a, w2d)
    N, Co, H, W = y.shape
    return y.reshape(N, Co, H // 2, 2, W // 2, 2).mean(axis=(3, 5))


if __name__ == "__main__":
    N, Cin, H, W = 2, 4, 16, 16
    Cout = 2  # typical DenseNet transition halves the channel count

    key = jax.random.PRNGKey(0)
    kx, kg, kb, km, kv, kw = jax.random.split(key, 6)

    x = jax.random.normal(kx, (N, Cin, H, W), dtype=jnp.float32)
    gamma = jax.random.normal(kg, (Cin,), dtype=jnp.float32) * 0.1 + 1.0
    beta = jax.random.normal(kb, (Cin,), dtype=jnp.float32) * 0.1
    running_mean = jax.random.normal(km, (Cin,), dtype=jnp.float32) * 0.1
    running_var = jax.random.uniform(kv, (Cin,), dtype=jnp.float32, minval=0.5, maxval=1.5)
    conv_w = jax.random.normal(kw, (Cout, Cin, 1, 1), dtype=jnp.float32) * 0.1

    ref = _reference(x, gamma, beta, running_mean, running_var, conv_w)

    # f32 MXU path (exact)
    out = transition_forward(x, gamma, beta, running_mean, running_var, conv_w)
    out = jax.block_until_ready(out)
    assert out.shape == (N, Cout, H // 2, W // 2), out.shape
    np.testing.assert_allclose(np.asarray(out), np.asarray(ref), rtol=1e-5, atol=1e-5)

    # bf16 MXU operand path (f32 accumulation) -- looser tolerance
    out_bf16 = transition_forward(x, gamma, beta, running_mean, running_var, conv_w,
                                  use_bf16_matmul=True)
    out_bf16 = jax.block_until_ready(out_bf16)
    np.testing.assert_allclose(np.asarray(out_bf16), np.asarray(ref), rtol=5e-2, atol=1e-2)

    print("KERNEL_OK")
</pallas_src>

<mosaic_0001>
module attributes {stable_mosaic.version = 11 : i64} {
  func.func @_transition_kernel(%arg0: i32, %arg1: i32, %arg2: memref<1x8x8x8xf32, #tpu.memory_space<vmem>>, %arg3: memref<1x8xf32, #tpu.memory_space<vmem>>, %arg4: memref<1x8xf32, #tpu.memory_space<vmem>>, %arg5: memref<4x2xf32, #tpu.memory_space<vmem>>, %arg6: memref<1x4x8x2xf32, #tpu.memory_space<vmem>>) attributes {dimension_semantics = [#tpu.dimension_semantics<parallel>, #tpu.dimension_semantics<parallel>], iteration_bounds = array<i64: 2, 2>, scalar_prefetch = 0 : i64, scratch_operands = 0 : i64, tpu.core_type = #tpu.core_type<tc>, window_params = [{transform_indices = @transform_0, window_bounds = array<i64: 1, 8, 8, 8>}, {pipeline_mode = #tpu.pipeline_mode<synchronous>, transform_indices = @transform_1, window_bounds = array<i64: 1, 8>}, {pipeline_mode = #tpu.pipeline_mode<synchronous>, transform_indices = @transform_2, window_bounds = array<i64: 1, 8>}, {pipeline_mode = #tpu.pipeline_mode<synchronous>, transform_indices = @transform_3, window_bounds = array<i64: 4, 2>}, {transform_indices = @transform_4, window_bounds = array<i64: 1, 4, 8, 2>}]} {
    %c0 = arith.constant 0 : index
    %c0_0 = arith.constant 0 : index
    %c0_1 = arith.constant 0 : index
    %c0_2 = arith.constant 0 : index
    %0 = vector.load %arg2[%c0, %c0_0, %c0_1, %c0_2] : memref<1x8x8x8xf32, #tpu.memory_space<vmem>>, vector<1x8x8x8xf32>
    %1 = vector.shape_cast %0 : vector<1x8x8x8xf32> to vector<8x8x8xf32>
    %c0_3 = arith.constant 0 : index
    %c0_4 = arith.constant 0 : index
    %2 = vector.load %arg3[%c0_3, %c0_4] : memref<1x8xf32, #tpu.memory_space<vmem>>, vector<1x8xf32>
    %3 = vector.shape_cast %2 : vector<1x8xf32> to vector<1x1x8xf32>
    %4 = vector.broadcast %3 : vector<1x1x8xf32> to vector<8x8x8xf32>
    %5 = arith.mulf %1, %4 : vector<8x8x8xf32>
    %c0_5 = arith.constant 0 : index
    %c0_6 = arith.constant 0 : index
    %6 = vector.load %arg4[%c0_5, %c0_6] : memref<1x8xf32, #tpu.memory_space<vmem>>, vector<1x8xf32>
    %7 = vector.shape_cast %6 : vector<1x8xf32> to vector<1x1x8xf32>
    %8 = vector.broadcast %7 : vector<1x1x8xf32> to vector<8x8x8xf32>
    %9 = arith.addf %5, %8 : vector<8x8x8xf32>
    %cst = arith.constant 0.000000e+00 : f32
    %10 = vector.broadcast %cst : f32 to vector<8x8x8xf32>
    %11 = arith.maximumf %9, %10 : vector<8x8x8xf32>
    %12 = vector.extract_strided_slice %11 {offsets = [0, 0, 0], sizes = [8, 8, 4], strides = [1, 1, 1]} : vector<8x8x8xf32> to vector<8x8x4xf32>
    %13 = vector.extract_strided_slice %11 {offsets = [0, 0, 4], sizes = [8, 8, 4], strides = [1, 1, 1]} : vector<8x8x8xf32> to vector<8x8x4xf32>
    %14 = arith.addf %12, %13 : vector<8x8x4xf32>
    %15 = vector.shape_cast %14 : vector<8x8x4xf32> to vector<4x2x8x4xf32>
    %16 = vector.extract_strided_slice %15 {offsets = [0, 0, 0, 0], sizes = [4, 1, 8, 4], strides = [1, 1, 1, 1]} : vector<4x2x8x4xf32> to vector<4x1x8x4xf32>
    %17 = vector.shape_cast %16 : vector<4x1x8x4xf32> to vector<4x8x4xf32>
    %18 = vector.extract_strided_slice %15 {offsets = [0, 1, 0, 0], sizes = [4, 1, 8, 4], strides = [1, 1, 1, 1]} : vector<4x2x8x4xf32> to vector<4x1x8x4xf32>
    %19 = vector.shape_cast %18 : vector<4x1x8x4xf32> to vector<4x8x4xf32>
    %20 = arith.addf %17, %19 : vector<4x8x4xf32>
    %cst_7 = arith.constant 2.500000e-01 : f32
    %21 = vector.broadcast %cst_7 : f32 to vector<4x8x4xf32>
    %22 = arith.mulf %20, %21 : vector<4x8x4xf32>
    %23 = vector.shape_cast %22 : vector<4x8x4xf32> to vector<32x4xf32>
    %c0_8 = arith.constant 0 : index
    %c0_9 = arith.constant 0 : index
    %24 = vector.load %arg5[%c0_8, %c0_9] : memref<4x2xf32, #tpu.memory_space<vmem>>, vector<4x2xf32>
    %cst_10 = arith.constant dense<0.000000e+00> : vector<32x2xf32>
    %25 = tpu.matmul %23, %24, %cst_10 {dimension_numbers = #tpu.dot_dimension_numbers<[1], [0], [0], [1], [0, 0, 1, 1], [], []>} : vector<32x4xf32>, vector<4x2xf32>, vector<32x2xf32> -> vector<32x2xf32>
    %26 = vector.shape_cast %25 : vector<32x2xf32> to vector<4x8x2xf32>
    %c0_11 = arith.constant 0 : index
    %c0_12 = arith.constant 0 : index
    %c0_13 = arith.constant 0 : index
    %c0_14 = arith.constant 0 : index
    %27 = vector.load %arg6[%c0_11, %c0_12, %c0_13, %c0_14] : memref<1x4x8x2xf32, #tpu.memory_space<vmem>>, vector<1x4x8x2xf32>
    %28 = vector.shape_cast %27 : vector<1x4x8x2xf32> to vector<4x8x2xf32>
    %29 = vector.shape_cast %26 : vector<4x8x2xf32> to vector<1x4x8x2xf32>
    tpu.vector_store %arg6[%c0_11, %c0_12, %c0_13, %c0_14], %29 {strides = array<i32>} : memref<1x4x8x2xf32, #tpu.memory_space<vmem>>, vector<1x4x8x2xf32>,
    return
  }
  func.func @transform_0(%arg0: i32, %arg1: i32) -> (i32, i32, i32, i32) {
    %c0_i32 = arith.constant 0 : i32
    %c0_i32_0 = arith.constant 0 : i32
    %c0_i32_1 = arith.constant 0 : i32
    return %arg0, %arg1, %c0_i32, %c0_i32_0 : i32, i32, i32, i32
  }
  func.func @transform_1(%arg0: i32, %arg1: i32) -> (i32, i32) {
    %c0_i32 = arith.constant 0 : i32
    %c0_i32_0 = arith.constant 0 : i32
    %c0_i32_1 = arith.constant 0 : i32
    return %c0_i32, %c0_i32_0 : i32, i32
  }
  func.func @transform_2(%arg0: i32, %arg1: i32) -> (i32, i32) {
    %c0_i32 = arith.constant 0 : i32
    %c0_i32_0 = arith.constant 0 : i32
    %c0_i32_1 = arith.constant 0 : i32
    return %c0_i32, %c0_i32_0 : i32, i32
  }
  func.func @transform_3(%arg0: i32, %arg1: i32) -> (i32, i32) {
    %c0_i32 = arith.constant 0 : i32
    %c0_i32_0 = arith.constant 0 : i32
    %c0_i32_1 = arith.constant 0 : i32
    return %c0_i32, %c0_i32_0 : i32, i32
  }
  func.func @transform_4(%arg0: i32, %arg1: i32) -> (i32, i32, i32, i32) {
    %c0_i32 = arith.constant 0 : i32
    %c0_i32_0 = arith.constant 0 : i32
    %c0_i32_1 = arith.constant 0 : i32
    return %arg0, %arg1, %c0_i32, %c0_i32_0 : i32, i32, i32, i32
  }
}

</mosaic_0001>

<bundles_post_ra>
// kernel: tpu_custom_call.1
= control target key start
LH: loop header
LB: loop body
LE: loop exit
PB: predicated region body
PF: predicated region fallthrough
CT: control target
= control target key end

     0   :  { %s671_s15 = smov 0   ;;  %s673_s16 = smov 0   ;;  %s743_s0 = inlined_call_operand.vmem [shape: f32[2,16,8,8], index: 0, kind: input, shape index: {}]   ;;  %s744_s1 = inlined_call_operand.vmem [shape: f32[1,8], index: 1, kind: input, shape index: {}]   ;;  %s745_s2 = inlined_call_operand.vmem [shape: f32[1,8], index: 2, kind: input, shape index: {}]   ;;  %s746_s3 = inlined_call_operand.vmem [shape: f32[4,2], index: 3, kind: input, shape index: {}]   ;;  %s747_s4 = inlined_call_operand.vmem [shape: f32[2,8,8,2], index: 4, kind: output, shape index: {}]  }
   0x1   :  { %s675_s17 = smov 0   ;;  %s677_s18 = smov 0  }
   0x2   :  { %s679_s19 = smov 0  }
   0x3 LB: > { %s23_s20 = sadd.s32 1, %s635_s17  ;;  %s26_s21 = sadd.s32 1, %s639_s18  ;;  %s643_s19 = sphi %s679_s19, %s14_s19   ;;  %s639_s18 = sphi %s677_s18, %s751_s18   ;;  %s635_s17 = sphi %s675_s17, %s750_s17   ;;  %s631_s16 = sphi %s673_s16, %s749_s16   ;;  %s627_s15 = sphi %s671_s15, %s748_s15  }
   0x4   : > { %p24_p0 = scmp.ge.s32.totalorder %s23_s20, 2  ;;  %p533_p1 = scmp.ge.s32.totalorder %s643_s19, 1 }
   0x5   : > { %p183_p2 = scmp.lt.s32.totalorder %s643_s19, 5 }
   0x6   : > { %s753_s20 = smov (%p24_p0, %s23_s20), 0  ;;  %s755_s21 = smov (!%p24_p0, %s26_s21), %s639_s18 }
   0x7   : > { %p184_p3 = pnand %p533_p1, %p183_p2  ;;  %p28_p4 = scmp.ge.s32.totalorder %s755_s21, 2 }
   0x8   : > { %s534_s22 = sshll.u32 (!%p184_p3), %s627_s15, 3  ;;  %p218_p5 = scmp.lt.s32.totalorder (!%p184_p3), %s631_s16, 1 }
   0x9   : > { %s757_s21 = smov (%p28_p4, %s755_s21), 0  ;;  %187 = sbr.rel (%p184_p3) target bundleno = 356 (0x164), region = 36 }
   0xa   : > { %p220_p6 = scmp.lt.s32.totalorder (!%p184_p3), %s534_s22, 15  ;;  %s645_s9 = smov (!%p184_p3), 124  }
   0xb   : > { %s537_s10 = sshll.u32 (!%p184_p3), %s627_s15, 2 }
   0xc   : > { %p230_p7 = scmp.lt.s32.totalorder (!%p184_p3), %s537_s10, 7 }
   0xe   : > { %s759_s16 = smov (!%p218_p5, %s631_s16), 1  ;;  %s761_s22 = smov (!%p220_p6, %s534_s22), 15  ;;  %v540_v0 = vld [vmem:[%s744_s1] ss:$0 sm:$0xff]  ;;  %vm345_vm0 = vcmask 1043456   ;;  %vm332_vm1 = vcmask 31744  }
   0xf   : > { %s535_s23 = sshll.u32 %s759_s16, 4  ;;  %v541_v1 = vld [vmem:[%s745_s2] ss:$0 sm:$0xff]  ;;  %s763_s10 = smov (!%p230_p7, %s537_s10), 7  ;;  %vm434_vm2 = vcmask 15360  }
  0x10   : > { %s223_s24 = sadd.s32 %s535_s23, %s761_s22  ;;  %v331_v22 = vld [vmem:[%s746_s3] sm:$0xf]  ;;  %s538_s11 = sshll.u32 %s759_s16, 3 }
  0x11   : > { %s536_s25 = sshll.u32 %s223_s24, 3  ;;  %554 = vmatprep.subr.msk.mxu0 %vm345_vm0, %v331_v22  ;;  %562 = vmatprep.subr.msk.mxu1 %vm345_vm0, %v331_v22  ;;  %s233_s12 = sadd.s32 %s538_s11, %s763_s10 }
  0x12   : > { %s225_s30 = scalar_lea.vmem %s743_s0, %s536_s25  ;;  %555 = vmatpush3.msk.msra.mxu0 %vm345_vm0, %v331_v22  ;;  %563 = vmatpush3.msk.msra.mxu1 %vm345_vm0, %v331_v22  ;;  %s539_s13 = sshll.u32 %s233_s12, 3 }
  0x13   : > { %v241_v2 = vld [vmem:[%s225_s30 + $0x20] sm:$0xff]  ;;  %v242_v4 = vld [vmem:[%s225_s30 + $0x28] sm:$0xff]  ;;  %v240_v9 = vld [vmem:[%s225_s30 + $0x18] sm:$0xff]  ;;  %s235_s23 = scalar_lea.vmem %s747_s4, %s539_s13 }
  0x14   : > { %v237_v3 = vld [vmem:[%s225_s30] sm:$0xff]  ;;  %v256_v5 = vmul.f32 %v540_v0, %v241_v2  ;;  %v257_v7 = vmul.f32 %v540_v0, %v242_v4  ;;  %v238_v8 = vld [vmem:[%s225_s30 + $0x8] sm:$0xff]  ;;  %v239_v10 = vld [vmem:[%s225_s30 + $0x10] sm:$0xff]  ;;  %v255_v12 = vmul.f32 %v540_v0, %v240_v9 }
  0x15   : > { %v252_v6 = vmul.f32 %v540_v0, %v237_v3  ;;  %v253_v11 = vmul.f32 %v540_v0, %v238_v8  ;;  %v254_v13 = vmul.f32 %v540_v0, %v239_v10  ;;  %v244_v17 = vld [vmem:[%s225_s30 + $0x38] sm:$0xff]  ;;  %v243_v19 = vld [vmem:[%s225_s30 + $0x30] sm:$0xff] }
  0x16   : > { %v271_v14 = vadd.f32 %v541_v1, %v256_v5  ;;  %v272_v16 = vadd.f32 %v541_v1, %v257_v7  ;;  %v270_v23 = vadd.f32 %v541_v1, %v255_v12  ;;  %v259_v25 = vmul.f32 %v540_v0, %v244_v17 }
  0x17   : > { %v267_v15 = vadd.f32 %v541_v1, %v252_v6  ;;  %v268_v18 = vadd.f32 %v541_v1, %v253_v11  ;;  %v269_v24 = vadd.f32 %v541_v1, %v254_v13  ;;  %v258_v28 = vmul.f32 %v540_v0, %v243_v19 }
  0x18   : > { %v279_v20 = vmax.f32 %v271_v14, 0.0  ;;  %v280_v26 = vmax.f32 %v272_v16, 0.0  ;;  %v278_v29 = vmax.f32 %v270_v23, 0.0  ;;  %v274_v31 = vadd.f32 %v541_v1, %v259_v25 }
  0x19   : > { %v275_v21 = vmax.f32 %v267_v15, 0.0  ;;  %v276_v27 = vmax.f32 %v268_v18, 0.0  ;;  %v277_v30 = vmax.f32 %v269_v24, 0.0  ;;  %v273_v32 = vadd.f32 %v541_v1, %v258_v28 }
  0x1a   : > { %299 = vrot.lane.b32.xlu1 %v279_v20, %s645_s9  ;;  %v282_v33 = vmax.f32 %v274_v31, 0.0 }
  0x1b   : > { %291 = vrot.lane.b32.xlu0 %v275_v21, %s645_s9  ;;  %v281_v34 = vmax.f32 %v273_v32, 0.0 }
  0x1e   : > { %301 = vrot.lane.b32.xlu1 %v280_v26, %s645_s9 }
  0x1f   : > { %293 = vrot.lane.b32.xlu0 %v276_v27, %s645_s9 }
  0x22   : > { %297 = vrot.lane.b32.xlu1 %v278_v29, %s645_s9 }
  0x23   : > { %295 = vrot.lane.b32.xlu0 %v277_v30, %s645_s9 }
  0x26   : > { %305 = vrot.lane.b32.xlu1 %v282_v33, %s645_s9 }
  0x27   : > { %303 = vrot.lane.b32.xlu0 %v281_v34, %s645_s9 }
  0x8c   : > { %v300_v35 = vpop.permute.xlu1 %299 }
  0x8d   : > { %v292_v36 = vpop.permute.xlu0 %291  ;;  %v319_v39 = vadd.f32 %v300_v35, %v279_v20 }
  0x8e   : > { %v315_v40 = vadd.f32 %v292_v36, %v275_v21 }
  0x90   : > { %v302_v37 = vpop.permute.xlu1 %301 }
  0x91   : > { %v294_v38 = vpop.permute.xlu0 %293  ;;  %v320_v41 = vadd.f32 %v302_v37, %v280_v26 }
  0x92   : > { %v316_v42 = vadd.f32 %v294_v38, %v276_v27 }
  0x93   : > { %v325_v44 = vadd.f32 %v320_v41, %v319_v39 }
  0x94   : > { %v323_v43 = vadd.f32 %v316_v42, %v315_v40  ;;  %v298_v45 = vpop.permute.xlu1 %297 }
  0x95   : > { %v296_v46 = vpop.permute.xlu0 %295  ;;  %v318_v47 = vadd.f32 %v298_v45, %v278_v29  ;;  %v329_v50 = vmul.f32 0.25, %v325_v44 }
  0x96   : > { %v317_v48 = vadd.f32 %v296_v46, %v277_v30  ;;  %v327_v49 = vmul.f32 0.25, %v323_v43 }
  0x97   : > { %559 = vmatprep.mubr.msk.f32.mxu1 %vm332_vm1, %v329_v50 }
  0x98   : > { %v324_v51 = vadd.f32 %v318_v47, %v317_v48  ;;  %556 = vmatprep.mubr.msk.f32.mxu0 %vm332_vm1, %v327_v49  ;;  %v306_v52 = vpop.permute.xlu1 %305 }
  0x99   : > { %v304_v53 = vpop.permute.xlu0 %303  ;;  %v322_v55 = vadd.f32 %v306_v52, %v282_v33 }
  0x9a   : > { %v328_v54 = vmul.f32 0.25, %v324_v51  ;;  %v321_v56 = vadd.f32 %v304_v53, %v281_v34 }
  0x9c   : > { %v326_v57 = vadd.f32 %v322_v55, %v321_v56  ;;  %557 = vmatmul.mubr.msk.f32.vlgmr.msra.gmra.mxu0 %vm332_vm1, %v328_v54 }
  0x9e   : > { %v330_v58 = vmul.f32 0.25, %v326_v57 }
  0xa0   : > { %560 = vmatmul.mubr.msk.f32.vlgmr.msra.gmra.mxu1 %vm332_vm1, %v330_v58 }
 0x15c   : > { %v558_v59 = vpop.f32.mrf.mxu0 }
 0x15d   : > { %436 = vst.msk [vmem:[%s235_s23 + $0x8] sm:$0xff] %vm434_vm2, %v558_v59 }
 0x15e   : > { %v415_v60 = vpop.f32.mrf.mxu0 }
 0x15f   : > { %435 = vst.msk [vmem:[%s235_s23] sm:$0xff] %vm434_vm2, %v415_v60 }
 0x160   : > { %v561_v61 = vpop.f32.mrf.mxu1 }
 0x161   : > { %438 = vst.msk [vmem:[%s235_s23 + $0x18] sm:$0xff] %vm434_vm2, %v561_v61 }
 0x162   : > { %v425_v62 = vpop.f32.mrf.mxu1 }
 0x163   : > { %437 = vst.msk [vmem:[%s235_s23 + $0x10] sm:$0xff] %vm434_vm2, %v425_v62 }
 0x164 PF: > { %s14_s19 = sadd.s32 1, %s643_s19   ;;  %s748_s15 = smov %s635_s17 }
 0x165   : > { %p11_p8 = scmp.ge.s32.totalorder %s14_s19, 6   ;;  %s749_s16 = smov %s639_s18 }
 0x166   : > { %s750_s17 = smov %s753_s20  ;;  %s751_s18 = smov %s757_s21 }
 0x167   :  { %13 = sbr.rel (!%p11_p8) target bundleno = 3 (0x3), region = 66 }

</bundles_post_ra>
